<compile_context>
chip_gen: v7x
topology: tpu7x:2x2x1
jax: 0.10.0
libtpu: 0.0.40
codegen_flags: <defaults>
</compile_context>

<pallas_src>
import math

import jax
import jax.numpy as jnp
from jax import lax
from jax.experimental import pallas as pl
from jax.experimental.pallas import tpu as pltpu

# ---- config (small, deterministic) ----
BATCH = 2
SEQ = 8
HIDDEN = 32
NUM_HEADS = 4
HEAD_DIM = HIDDEN // NUM_HEADS
LN_EPS = 1e-12


def bert_attention_kernel(
    x_ref,      # (1, S, H)   current batch's tokens
    mask_ref,   # (1, 1, S)   additive mask row (broadcast over heads / query rows)
    wqkv_ref,   # (H, 3H)     fused [Wq*inv_sqrt_d | Wk | Wv]
    bqkv_ref,   # (1, 3H)
    wo_ref,     # (H, H)
    bo_ref,     # (1, H)
    gamma_ref,  # (1, H)
    beta_ref,   # (1, H)
    out_ref,    # (1, S, H)
    ctx_ref,    # (S, H) f32 VMEM scratch: per-head contexts assembled by lane offset
):
    _, S, H = x_ref.shape
    D = H // NUM_HEADS

    x2 = x_ref[...].reshape(S, H)                           # leading-dim merge only

    # ---- fused Q/K/V projection: ONE MXU matmul (scale pre-folded into Q columns) ----
    qkv = jnp.dot(x2, wqkv_ref[...],
                  preferred_element_type=jnp.float32) + bqkv_ref[...]   # (S, 3H)

    mask_row = mask_ref[...].reshape(1, S)                  # broadcast over query rows

    for h in range(NUM_HEADS):
        lo = h * D
        qh = qkv[:, lo:lo + D]                              # (S, D) static lane slices
        kh = qkv[:, H + lo:H + lo + D]
        vh = qkv[:, 2 * H + lo:2 * H + lo + D]

        s = jnp.einsum('qd,kd->qk', qh, kh,
                       preferred_element_type=jnp.float32)  # (S, S)
        s = s + mask_row
        s = s - jnp.max(s, axis=-1, keepdims=True)          # numerically stable softmax
        p = jnp.exp(s)
        p = p / jnp.sum(p, axis=-1, keepdims=True)          # exact divide (eval dropout = id)

        # context for head h lands in its lane offset of the shared (S, H) scratch
        ctx_ref[:, lo:lo + D] = jnp.dot(p, vh, preferred_element_type=jnp.float32)

    # ---- single output projection (K = H) + bias + residual + LayerNorm ----
    y = jnp.dot(ctx_ref[...], wo_ref[...],
                preferred_element_type=jnp.float32) + bo_ref[...] + x2
    u = jnp.mean(y, axis=-1, keepdims=True)
    var = jnp.mean((y - u) ** 2, axis=-1, keepdims=True)
    yn = (y - u) * lax.rsqrt(var + LN_EPS)                  # EUP rsqrt
    out_ref[...] = (gamma_ref[...] * yn + beta_ref[...]).reshape(1, S, H).astype(out_ref.dtype)


@jax.jit
def bert_attention(x, attention_mask, fparams):
    """x: [B, S, H] float32, attention_mask: [B, 1, 1, S] float32 (additive)."""
    B, S, H = x.shape
    mask3 = attention_mask.reshape(B, 1, S)   # squeeze broadcast dims (free metadata reshape)

    pinned = lambda b: (0, 0)                 # weights resident across the batch grid
    return pl.pallas_call(
        bert_attention_kernel,
        out_shape=jax.ShapeDtypeStruct((B, S, H), jnp.float32),
        grid_spec=pltpu.PrefetchScalarGridSpec(
            num_scalar_prefetch=0,
            grid=(B,),
            in_specs=[
                pl.BlockSpec((1, S, H), lambda b: (b, 0, 0)),    # x
                pl.BlockSpec((1, 1, S), lambda b: (b, 0, 0)),    # additive mask row
                pl.BlockSpec((H, 3 * H), pinned),                # fused Wqkv
                pl.BlockSpec((1, 3 * H), pinned),                # fused bqkv
                pl.BlockSpec((H, H), pinned),                    # Wo
                pl.BlockSpec((1, H), pinned),                    # bo
                pl.BlockSpec((1, H), pinned),                    # gamma
                pl.BlockSpec((1, H), pinned),                    # beta
            ],
            out_specs=pl.BlockSpec((1, S, H), lambda b: (b, 0, 0)),
            scratch_shapes=[pltpu.VMEM((S, H), jnp.float32)],
        ),
        compiler_params=pltpu.CompilerParams(
            dimension_semantics=("parallel",)),                  # v7x: both TensorCores
    )(
        x, mask3,
        fparams["wqkv"], fparams["bqkv"],
        fparams["wo"], fparams["bo"],
        fparams["gamma"], fparams["beta"],
    )


def init_params(key, hidden):
    """Module-faithful separate Q/K/V/O parameters (PyTorch layout, stored as [in, out])."""
    ks = jax.random.split(key, 8)
    scale = 0.02
    return {
        "wq": scale * jax.random.normal(ks[0], (hidden, hidden), jnp.float32),
        "bq": scale * jax.random.normal(ks[1], (1, hidden), jnp.float32),
        "wk": scale * jax.random.normal(ks[2], (hidden, hidden), jnp.float32),
        "bk": scale * jax.random.normal(ks[3], (1, hidden), jnp.float32),
        "wv": scale * jax.random.normal(ks[4], (hidden, hidden), jnp.float32),
        "bv": scale * jax.random.normal(ks[5], (1, hidden), jnp.float32),
        "wo": scale * jax.random.normal(ks[6], (hidden, hidden), jnp.float32),
        "bo": scale * jax.random.normal(ks[7], (1, hidden), jnp.float32),
        "gamma": jnp.ones((1, hidden), jnp.float32),
        "beta": jnp.zeros((1, hidden), jnp.float32),
    }


def fuse_params(p):
    """One-time host transform: fuse QKV and fold 1/sqrt(D) into the Q columns."""
    inv_sqrt_d = 1.0 / math.sqrt(HEAD_DIM)
    return {
        "wqkv": jnp.concatenate([p["wq"] * inv_sqrt_d, p["wk"], p["wv"]], axis=1),  # (H, 3H)
        "bqkv": jnp.concatenate([p["bq"] * inv_sqrt_d, p["bk"], p["bv"]], axis=1),  # (1, 3H)
        "wo": p["wo"], "bo": p["bo"], "gamma": p["gamma"], "beta": p["beta"],
    }


def reference_bert_attention(x, mask, p):
    """Pure-JAX reference mirroring the PyTorch module (eval mode), unfused params."""
    B, S, H = x.shape
    q = x @ p["wq"] + p["bq"][0]
    k = x @ p["wk"] + p["bk"][0]
    v = x @ p["wv"] + p["bv"][0]

    def split_heads(t):
        return t.reshape(B, S, NUM_HEADS, HEAD_DIM).transpose(0, 2, 1, 3)

    qh, kh, vh = split_heads(q), split_heads(k), split_heads(v)
    scores = jnp.einsum("bhqd,bhkd->bhqk", qh, kh) / math.sqrt(HEAD_DIM)
    scores = scores + mask  # (B,1,1,S) broadcast
    probs = jax.nn.softmax(scores, axis=-1)
    ctx = jnp.einsum("bhqk,bhkd->bhqd", probs, vh)
    ctx = ctx.transpose(0, 2, 1, 3).reshape(B, S, H)

    out = ctx @ p["wo"] + p["bo"][0]
    y = out + x
    u = jnp.mean(y, axis=-1, keepdims=True)
    s = jnp.mean((y - u) ** 2, axis=-1, keepdims=True)
    yn = (y - u) / jnp.sqrt(s + LN_EPS)
    return p["gamma"][0] * yn + p["beta"][0]


if __name__ == "__main__":
    key = jax.random.PRNGKey(0)
    k_x, k_m, k_p = jax.random.split(key, 3)

    x = jax.random.normal(k_x, (BATCH, SEQ, HIDDEN), jnp.float32)
    # additive attention mask: 0 for attend, -10000 for masked (BERT convention)
    keep = (jax.random.uniform(k_m, (BATCH, 1, 1, SEQ)) > 0.2).astype(jnp.float32)
    attention_mask = (1.0 - keep) * -10000.0

    params = init_params(k_p, HIDDEN)
    fparams = fuse_params(params)          # one-time host-side weight prep

    out = bert_attention(x, attention_mask, fparams)
    out = jax.block_until_ready(out)

    ref = reference_bert_attention(x, attention_mask, params)
    assert out.shape == (BATCH, SEQ, HIDDEN)
    assert jnp.allclose(out, ref, atol=1e-4, rtol=1e-4), (
        f"max abs diff {jnp.max(jnp.abs(out - ref))}")

    print("KERNEL_OK")
</pallas_src>

<mosaic_0001>
module attributes {stable_mosaic.version = 11 : i64} {
  func.func @bert_attention_kernel(%arg0: i32, %arg1: memref<1x8x32xf32, #tpu.memory_space<vmem>>, %arg2: memref<1x1x8xf32, #tpu.memory_space<vmem>>, %arg3: memref<32x96xf32, #tpu.memory_space<vmem>>, %arg4: memref<1x96xf32, #tpu.memory_space<vmem>>, %arg5: memref<32x32xf32, #tpu.memory_space<vmem>>, %arg6: memref<1x32xf32, #tpu.memory_space<vmem>>, %arg7: memref<1x32xf32, #tpu.memory_space<vmem>>, %arg8: memref<1x32xf32, #tpu.memory_space<vmem>>, %arg9: memref<1x8x32xf32, #tpu.memory_space<vmem>>, %arg10: memref<8x32xf32, #tpu.memory_space<vmem>>) attributes {dimension_semantics = [#tpu.dimension_semantics<parallel>], iteration_bounds = array<i64: 2>, scalar_prefetch = 0 : i64, scratch_operands = 1 : i64, tpu.core_type = #tpu.core_type<tc>, window_params = [{transform_indices = @transform_0, window_bounds = array<i64: 1, 8, 32>}, {transform_indices = @transform_1, window_bounds = array<i64: 1, 1, 8>}, {pipeline_mode = #tpu.pipeline_mode<synchronous>, transform_indices = @transform_2, window_bounds = array<i64: 32, 96>}, {pipeline_mode = #tpu.pipeline_mode<synchronous>, transform_indices = @transform_3, window_bounds = array<i64: 1, 96>}, {pipeline_mode = #tpu.pipeline_mode<synchronous>, transform_indices = @transform_4, window_bounds = array<i64: 32, 32>}, {pipeline_mode = #tpu.pipeline_mode<synchronous>, transform_indices = @transform_5, window_bounds = array<i64: 1, 32>}, {pipeline_mode = #tpu.pipeline_mode<synchronous>, transform_indices = @transform_6, window_bounds = array<i64: 1, 32>}, {pipeline_mode = #tpu.pipeline_mode<synchronous>, transform_indices = @transform_7, window_bounds = array<i64: 1, 32>}, {transform_indices = @transform_8, window_bounds = array<i64: 1, 8, 32>}]} {
    %c0 = arith.constant 0 : index
    %c0_0 = arith.constant 0 : index
    %c0_1 = arith.constant 0 : index
    %0 = vector.load %arg1[%c0, %c0_0, %c0_1] : memref<1x8x32xf32, #tpu.memory_space<vmem>>, vector<1x8x32xf32>
    %1 = vector.shape_cast %0 : vector<1x8x32xf32> to vector<8x32xf32>
    %c0_2 = arith.constant 0 : index
    %c0_3 = arith.constant 0 : index
    %2 = vector.load %arg3[%c0_2, %c0_3] : memref<32x96xf32, #tpu.memory_space<vmem>>, vector<32x96xf32>
    %cst = arith.constant dense<0.000000e+00> : vector<8x96xf32>
    %3 = tpu.matmul %1, %2, %cst {dimension_numbers = #tpu.dot_dimension_numbers<[1], [0], [0], [1], [0, 0, 1, 1], [], []>} : vector<8x32xf32>, vector<32x96xf32>, vector<8x96xf32> -> vector<8x96xf32>
    %c0_4 = arith.constant 0 : index
    %c0_5 = arith.constant 0 : index
    %4 = vector.load %arg4[%c0_4, %c0_5] : memref<1x96xf32, #tpu.memory_space<vmem>>, vector<1x96xf32>
    %5 = vector.broadcast %4 : vector<1x96xf32> to vector<8x96xf32>
    %6 = arith.addf %3, %5 : vector<8x96xf32>
    %c0_6 = arith.constant 0 : index
    %c0_7 = arith.constant 0 : index
    %c0_8 = arith.constant 0 : index
    %7 = vector.load %arg2[%c0_6, %c0_7, %c0_8] : memref<1x1x8xf32, #tpu.memory_space<vmem>>, vector<1x1x8xf32>
    %8 = vector.shape_cast %7 : vector<1x1x8xf32> to vector<1x8xf32>
    %9 = vector.extract_strided_slice %6 {offsets = [0, 0], sizes = [8, 8], strides = [1, 1]} : vector<8x96xf32> to vector<8x8xf32>
    %10 = vector.extract_strided_slice %6 {offsets = [0, 32], sizes = [8, 8], strides = [1, 1]} : vector<8x96xf32> to vector<8x8xf32>
    %11 = vector.extract_strided_slice %6 {offsets = [0, 64], sizes = [8, 8], strides = [1, 1]} : vector<8x96xf32> to vector<8x8xf32>
    "tpu.trace_start"() <{level = 10 : i32, message = "qd,kd->qk"}> : () -> ()
    %cst_9 = arith.constant dense<0.000000e+00> : vector<8x8xf32>
    %12 = tpu.matmul %9, %10, %cst_9 {dimension_numbers = #tpu.dot_dimension_numbers<[1], [1], [0], [0], [0, 0, 1, 0], [], []>} : vector<8x8xf32>, vector<8x8xf32>, vector<8x8xf32> -> vector<8x8xf32>
    "tpu.trace_stop"() : () -> ()
    %13 = vector.broadcast %8 : vector<1x8xf32> to vector<8x8xf32>
    %14 = arith.addf %12, %13 : vector<8x8xf32>
    %cst_10 = arith.constant dense<0xFF800000> : vector<8xf32>
    %15 = vector.multi_reduction <maximumf>, %14, %cst_10 [1] : vector<8x8xf32> to vector<8xf32>
    %16 = vector.shape_cast %15 : vector<8xf32> to vector<8x1xf32>
    %17 = vector.broadcast %16 : vector<8x1xf32> to vector<8x8xf32>
    %18 = arith.subf %14, %17 : vector<8x8xf32>
    %19 = math.exp %18 : vector<8x8xf32>
    %cst_11 = arith.constant dense<0.000000e+00> : vector<8xf32>
    %20 = vector.multi_reduction <add>, %19, %cst_11 [1] : vector<8x8xf32> to vector<8xf32>
    %21 = vector.shape_cast %20 : vector<8xf32> to vector<8x1xf32>
    %22 = vector.broadcast %21 : vector<8x1xf32> to vector<8x8xf32>
    %23 = arith.divf %19, %22 : vector<8x8xf32>
    %cst_12 = arith.constant dense<0.000000e+00> : vector<8x8xf32>
    %24 = tpu.matmul %23, %11, %cst_12 {dimension_numbers = #tpu.dot_dimension_numbers<[1], [0], [0], [1], [0, 0, 1, 1], [], []>} : vector<8x8xf32>, vector<8x8xf32>, vector<8x8xf32> -> vector<8x8xf32>
    %c0_13 = arith.constant 0 : index
    %c0_14 = arith.constant 0 : index
    %25 = vector.load %arg10[%c0_13, %c0_14] : memref<8x32xf32, #tpu.memory_space<vmem>>, vector<8x8xf32>
    tpu.vector_store %arg10[%c0_13, %c0_14], %24 {strides = array<i32>} : memref<8x32xf32, #tpu.memory_space<vmem>>, vector<8x8xf32>,
    %26 = vector.extract_strided_slice %6 {offsets = [0, 8], sizes = [8, 8], strides = [1, 1]} : vector<8x96xf32> to vector<8x8xf32>
    %27 = vector.extract_strided_slice %6 {offsets = [0, 40], sizes = [8, 8], strides = [1, 1]} : vector<8x96xf32> to vector<8x8xf32>
    %28 = vector.extract_strided_slice %6 {offsets = [0, 72], sizes = [8, 8], strides = [1, 1]} : vector<8x96xf32> to vector<8x8xf32>
    "tpu.trace_start"() <{level = 10 : i32, message = "qd,kd->qk"}> : () -> ()
    %cst_15 = arith.constant dense<0.000000e+00> : vector<8x8xf32>
    %29 = tpu.matmul %26, %27, %cst_15 {dimension_numbers = #tpu.dot_dimension_numbers<[1], [1], [0], [0], [0, 0, 1, 0], [], []>} : vector<8x8xf32>, vector<8x8xf32>, vector<8x8xf32> -> vector<8x8xf32>
    "tpu.trace_stop"() : () -> ()
    %30 = vector.broadcast %8 : vector<1x8xf32> to vector<8x8xf32>
    %31 = arith.addf %29, %30 : vector<8x8xf32>
    %cst_16 = arith.constant dense<0xFF800000> : vector<8xf32>
    %32 = vector.multi_reduction <maximumf>, %31, %cst_16 [1] : vector<8x8xf32> to vector<8xf32>
    %33 = vector.shape_cast %32 : vector<8xf32> to vector<8x1xf32>
    %34 = vector.broadcast %33 : vector<8x1xf32> to vector<8x8xf32>
    %35 = arith.subf %31, %34 : vector<8x8xf32>
    %36 = math.exp %35 : vector<8x8xf32>
    %cst_17 = arith.constant dense<0.000000e+00> : vector<8xf32>
    %37 = vector.multi_reduction <add>, %36, %cst_17 [1] : vector<8x8xf32> to vector<8xf32>
    %38 = vector.shape_cast %37 : vector<8xf32> to vector<8x1xf32>
    %39 = vector.broadcast %38 : vector<8x1xf32> to vector<8x8xf32>
    %40 = arith.divf %36, %39 : vector<8x8xf32>
    %cst_18 = arith.constant dense<0.000000e+00> : vector<8x8xf32>
    %41 = tpu.matmul %40, %28, %cst_18 {dimension_numbers = #tpu.dot_dimension_numbers<[1], [0], [0], [1], [0, 0, 1, 1], [], []>} : vector<8x8xf32>, vector<8x8xf32>, vector<8x8xf32> -> vector<8x8xf32>
    %c0_19 = arith.constant 0 : index
    %c8 = arith.constant 8 : index
    %42 = vector.load %arg10[%c0_19, %c8] : memref<8x32xf32, #tpu.memory_space<vmem>>, vector<8x8xf32>
    tpu.vector_store %arg10[%c0_19, %c8], %41 {strides = array<i32>} : memref<8x32xf32, #tpu.memory_space<vmem>>, vector<8x8xf32>,
    %43 = vector.extract_strided_slice %6 {offsets = [0, 16], sizes = [8, 8], strides = [1, 1]} : vector<8x96xf32> to vector<8x8xf32>
    %44 = vector.extract_strided_slice %6 {offsets = [0, 48], sizes = [8, 8], strides = [1, 1]} : vector<8x96xf32> to vector<8x8xf32>
    %45 = vector.extract_strided_slice %6 {offsets = [0, 80], sizes = [8, 8], strides = [1, 1]} : vector<8x96xf32> to vector<8x8xf32>
    "tpu.trace_start"() <{level = 10 : i32, message = "qd,kd->qk"}> : () -> ()
    %cst_20 = arith.constant dense<0.000000e+00> : vector<8x8xf32>
    %46 = tpu.matmul %43, %44, %cst_20 {dimension_numbers = #tpu.dot_dimension_numbers<[1], [1], [0], [0], [0, 0, 1, 0], [], []>} : vector<8x8xf32>, vector<8x8xf32>, vector<8x8xf32> -> vector<8x8xf32>
    "tpu.trace_stop"() : () -> ()
    %47 = vector.broadcast %8 : vector<1x8xf32> to vector<8x8xf32>
    %48 = arith.addf %46, %47 : vector<8x8xf32>
    %cst_21 = arith.constant dense<0xFF800000> : vector<8xf32>
    %49 = vector.multi_reduction <maximumf>, %48, %cst_21 [1] : vector<8x8xf32> to vector<8xf32>
    %50 = vector.shape_cast %49 : vector<8xf32> to vector<8x1xf32>
    %51 = vector.broadcast %50 : vector<8x1xf32> to vector<8x8xf32>
    %52 = arith.subf %48, %51 : vector<8x8xf32>
    %53 = math.exp %52 : vector<8x8xf32>
    %cst_22 = arith.constant dense<0.000000e+00> : vector<8xf32>
    %54 = vector.multi_reduction <add>, %53, %cst_22 [1] : vector<8x8xf32> to vector<8xf32>
    %55 = vector.shape_cast %54 : vector<8xf32> to vector<8x1xf32>
    %56 = vector.broadcast %55 : vector<8x1xf32> to vector<8x8xf32>
    %57 = arith.divf %53, %56 : vector<8x8xf32>
    %cst_23 = arith.constant dense<0.000000e+00> : vector<8x8xf32>
    %58 = tpu.matmul %57, %45, %cst_23 {dimension_numbers = #tpu.dot_dimension_numbers<[1], [0], [0], [1], [0, 0, 1, 1], [], []>} : vector<8x8xf32>, vector<8x8xf32>, vector<8x8xf32> -> vector<8x8xf32>
    %c0_24 = arith.constant 0 : index
    %c16 = arith.constant 16 : index
    %59 = vector.load %arg10[%c0_24, %c16] : memref<8x32xf32, #tpu.memory_space<vmem>>, vector<8x8xf32>
    tpu.vector_store %arg10[%c0_24, %c16], %58 {strides = array<i32>} : memref<8x32xf32, #tpu.memory_space<vmem>>, vector<8x8xf32>,
    %60 = vector.extract_strided_slice %6 {offsets = [0, 24], sizes = [8, 8], strides = [1, 1]} : vector<8x96xf32> to vector<8x8xf32>
    %61 = vector.extract_strided_slice %6 {offsets = [0, 56], sizes = [8, 8], strides = [1, 1]} : vector<8x96xf32> to vector<8x8xf32>
    %62 = vector.extract_strided_slice %6 {offsets = [0, 88], sizes = [8, 8], strides = [1, 1]} : vector<8x96xf32> to vector<8x8xf32>
    "tpu.trace_start"() <{level = 10 : i32, message = "qd,kd->qk"}> : () -> ()
    %cst_25 = arith.constant dense<0.000000e+00> : vector<8x8xf32>
    %63 = tpu.matmul %60, %61, %cst_25 {dimension_numbers = #tpu.dot_dimension_numbers<[1], [1], [0], [0], [0, 0, 1, 0], [], []>} : vector<8x8xf32>, vector<8x8xf32>, vector<8x8xf32> -> vector<8x8xf32>
    "tpu.trace_stop"() : () -> ()
    %64 = vector.broadcast %8 : vector<1x8xf32> to vector<8x8xf32>
    %65 = arith.addf %63, %64 : vector<8x8xf32>
    %cst_26 = arith.constant dense<0xFF800000> : vector<8xf32>
    %66 = vector.multi_reduction <maximumf>, %65, %cst_26 [1] : vector<8x8xf32> to vector<8xf32>
    %67 = vector.shape_cast %66 : vector<8xf32> to vector<8x1xf32>
    %68 = vector.broadcast %67 : vector<8x1xf32> to vector<8x8xf32>
    %69 = arith.subf %65, %68 : vector<8x8xf32>
    %70 = math.exp %69 : vector<8x8xf32>
    %cst_27 = arith.constant dense<0.000000e+00> : vector<8xf32>
    %71 = vector.multi_reduction <add>, %70, %cst_27 [1] : vector<8x8xf32> to vector<8xf32>
    %72 = vector.shape_cast %71 : vector<8xf32> to vector<8x1xf32>
    %73 = vector.broadcast %72 : vector<8x1xf32> to vector<8x8xf32>
    %74 = arith.divf %70, %73 : vector<8x8xf32>
    %cst_28 = arith.constant dense<0.000000e+00> : vector<8x8xf32>
    %75 = tpu.matmul %74, %62, %cst_28 {dimension_numbers = #tpu.dot_dimension_numbers<[1], [0], [0], [1], [0, 0, 1, 1], [], []>} : vector<8x8xf32>, vector<8x8xf32>, vector<8x8xf32> -> vector<8x8xf32>
    %c0_29 = arith.constant 0 : index
    %c24 = arith.constant 24 : index
    %76 = vector.load %arg10[%c0_29, %c24] : memref<8x32xf32, #tpu.memory_space<vmem>>, vector<8x8xf32>
    tpu.vector_store %arg10[%c0_29, %c24], %75 {strides = array<i32>} : memref<8x32xf32, #tpu.memory_space<vmem>>, vector<8x8xf32>,
    %c0_30 = arith.constant 0 : index
    %c0_31 = arith.constant 0 : index
    %77 = vector.load %arg10[%c0_30, %c0_31] : memref<8x32xf32, #tpu.memory_space<vmem>>, vector<8x32xf32>
    %c0_32 = arith.constant 0 : index
    %c0_33 = arith.constant 0 : index
    %78 = vector.load %arg5[%c0_32, %c0_33] : memref<32x32xf32, #tpu.memory_space<vmem>>, vector<32x32xf32>
    %cst_34 = arith.constant dense<0.000000e+00> : vector<8x32xf32>
    %79 = tpu.matmul %77, %78, %cst_34 {dimension_numbers = #tpu.dot_dimension_numbers<[1], [0], [0], [1], [0, 0, 1, 1], [], []>} : vector<8x32xf32>, vector<32x32xf32>, vector<8x32xf32> -> vector<8x32xf32>
    %c0_35 = arith.constant 0 : index
    %c0_36 = arith.constant 0 : index
    %80 = vector.load %arg6[%c0_35, %c0_36] : memref<1x32xf32, #tpu.memory_space<vmem>>, vector<1x32xf32>
    %81 = vector.broadcast %80 : vector<1x32xf32> to vector<8x32xf32>
    %82 = arith.addf %79, %81 : vector<8x32xf32>
    %83 = arith.addf %82, %1 : vector<8x32xf32>
    %cst_37 = arith.constant dense<0.000000e+00> : vector<8xf32>
    %84 = vector.multi_reduction <add>, %83, %cst_37 [1] : vector<8x32xf32> to vector<8xf32>
    %85 = vector.shape_cast %84 : vector<8xf32> to vector<8x1xf32>
    %cst_38 = arith.constant 3.200000e+01 : f32
    %86 = vector.broadcast %cst_38 : f32 to vector<8x1xf32>
    %87 = arith.divf %85, %86 : vector<8x1xf32>
    %88 = vector.broadcast %87 : vector<8x1xf32> to vector<8x32xf32>
    %89 = arith.subf %83, %88 : vector<8x32xf32>
    %90 = arith.mulf %89, %89 : vector<8x32xf32>
    %cst_39 = arith.constant dense<0.000000e+00> : vector<8xf32>
    %91 = vector.multi_reduction <add>, %90, %cst_39 [1] : vector<8x32xf32> to vector<8xf32>
    %92 = vector.shape_cast %91 : vector<8xf32> to vector<8x1xf32>
    %cst_40 = arith.constant 3.200000e+01 : f32
    %93 = vector.broadcast %cst_40 : f32 to vector<8x1xf32>
    %94 = arith.divf %92, %93 : vector<8x1xf32>
    %95 = vector.broadcast %87 : vector<8x1xf32> to vector<8x32xf32>
    %96 = arith.subf %83, %95 : vector<8x32xf32>
    %cst_41 = arith.constant 9.99999996E-13 : f32
    %97 = vector.broadcast %cst_41 : f32 to vector<8x1xf32>
    %98 = arith.addf %94, %97 : vector<8x1xf32>
    %99 = math.rsqrt %98 : vector<8x1xf32>
    %100 = vector.broadcast %99 : vector<8x1xf32> to vector<8x32xf32>
    %101 = arith.mulf %96, %100 : vector<8x32xf32>
    %c0_42 = arith.constant 0 : index
    %c0_43 = arith.constant 0 : index
    %102 = vector.load %arg7[%c0_42, %c0_43] : memref<1x32xf32, #tpu.memory_space<vmem>>, vector<1x32xf32>
    %103 = vector.broadcast %102 : vector<1x32xf32> to vector<8x32xf32>
    %104 = arith.mulf %103, %101 : vector<8x32xf32>
    %c0_44 = arith.constant 0 : index
    %c0_45 = arith.constant 0 : index
    %105 = vector.load %arg8[%c0_44, %c0_45] : memref<1x32xf32, #tpu.memory_space<vmem>>, vector<1x32xf32>
    %106 = vector.broadcast %105 : vector<1x32xf32> to vector<8x32xf32>
    %107 = arith.addf %104, %106 : vector<8x32xf32>
    %108 = vector.shape_cast %107 : vector<8x32xf32> to vector<1x8x32xf32>
    %c0_46 = arith.constant 0 : index
    %c0_47 = arith.constant 0 : index
    %c0_48 = arith.constant 0 : index
    %109 = vector.load %arg9[%c0_46, %c0_47, %c0_48] : memref<1x8x32xf32, #tpu.memory_space<vmem>>, vector<1x8x32xf32>
    tpu.vector_store %arg9[%c0_46, %c0_47, %c0_48], %108 {strides = array<i32>} : memref<1x8x32xf32, #tpu.memory_space<vmem>>, vector<1x8x32xf32>,
    return
  }
  func.func @transform_0(%arg0: i32) -> (i32, i32, i32) {
    %c0_i32 = arith.constant 0 : i32
    %c0_i32_0 = arith.constant 0 : i32
    %c0_i32_1 = arith.constant 0 : i32
    return %arg0, %c0_i32, %c0_i32_0 : i32, i32, i32
  }
  func.func @transform_1(%arg0: i32) -> (i32, i32, i32) {
    %c0_i32 = arith.constant 0 : i32
    %c0_i32_0 = arith.constant 0 : i32
    %c0_i32_1 = arith.constant 0 : i32
    return %arg0, %c0_i32, %c0_i32_0 : i32, i32, i32
  }
  func.func @transform_2(%arg0: i32) -> (i32, i32) {
    %c0_i32 = arith.constant 0 : i32
    %c0_i32_0 = arith.constant 0 : i32
    %c0_i32_1 = arith.constant 0 : i32
    return %c0_i32, %c0_i32_0 : i32, i32
  }
  func.func @transform_3(%arg0: i32) -> (i32, i32) {
    %c0_i32 = arith.constant 0 : i32
    %c0_i32_0 = arith.constant 0 : i32
    %c0_i32_1 = arith.constant 0 : i32
    return %c0_i32, %c0_i32_0 : i32, i32
  }
  func.func @transform_4(%arg0: i32) -> (i32, i32) {
    %c0_i32 = arith.constant 0 : i32
    %c0_i32_0 = arith.constant 0 : i32
    %c0_i32_1 = arith.constant 0 : i32
    return %c0_i32, %c0_i32_0 : i32, i32
  }
  func.func @transform_5(%arg0: i32) -> (i32, i32) {
    %c0_i32 = arith.constant 0 : i32
    %c0_i32_0 = arith.constant 0 : i32
    %c0_i32_1 = arith.constant 0 : i32
    return %c0_i32, %c0_i32_0 : i32, i32
  }
  func.func @transform_6(%arg0: i32) -> (i32, i32) {
    %c0_i32 = arith.constant 0 : i32
    %c0_i32_0 = arith.constant 0 : i32
    %c0_i32_1 = arith.constant 0 : i32
    return %c0_i32, %c0_i32_0 : i32, i32
  }
  func.func @transform_7(%arg0: i32) -> (i32, i32) {
    %c0_i32 = arith.constant 0 : i32
    %c0_i32_0 = arith.constant 0 : i32
    %c0_i32_1 = arith.constant 0 : i32
    return %c0_i32, %c0_i32_0 : i32, i32
  }
  func.func @transform_8(%arg0: i32) -> (i32, i32, i32) {
    %c0_i32 = arith.constant 0 : i32
    %c0_i32_0 = arith.constant 0 : i32
    %c0_i32_1 = arith.constant 0 : i32
    return %arg0, %c0_i32, %c0_i32_0 : i32, i32, i32
  }
}

</mosaic_0001>

<bundles_post_ra>
// kernel: bert_attention.1
= control target key start
LH: loop header
LB: loop body
LE: loop exit
PB: predicated region body
PF: predicated region fallthrough
CT: control target
= control target key end

     0   :  { %13 = vsyncpa [#allocation4], 0  ;;  %s2156_s0 = inlined_call_operand.hbm [shape: f32[2,8,32], index: 0, kind: input, shape index: {}]   ;;  %s2157_s1 = inlined_call_operand.vmem [shape: f32[2,1,8], index: 1, kind: input, shape index: {}]   ;;  %s2158_s2 = inlined_call_operand.hbm [shape: f32[32,96], index: 2, kind: input, shape index: {}]   ;;  %s2159_s3 = inlined_call_operand.vmem [shape: f32[1,96], index: 3, kind: input, shape index: {}]   ;;  %s2160_s4 = inlined_call_operand.hbm [shape: f32[32,32], index: 4, kind: input, shape index: {}]   ;;  %s2161_s5 = inlined_call_operand.vmem [shape: f32[1,32], index: 5, kind: input, shape index: {}]   ;;  %s2162_s6 = inlined_call_operand.vmem [shape: f32[1,32], index: 6, kind: input, shape index: {}]   ;;  %s2163_s7 = inlined_call_operand.vmem [shape: f32[1,32], index: 7, kind: input, shape index: {}]   ;;  %s2164_s8 = inlined_call_operand.hbm [shape: f32[2,8,32], index: 8, kind: output, shape index: {}]  }
   0x1   :  { %15 = vsyncpa [#allocation4 + $0x1], 0 }
   0x2   :  { %16 = vsyncpa [#allocation7], 0 }
   0x3   :  { %17 = vsyncpa [#allocation5], 0 }
   0x4   :  { %19 = vsyncpa [#allocation5 + $0x1], 0  ;;  %s1830_s27 = smov 0   ;;  %s1832_s28 = smov 0  }
   0x5   :  { %s1834_s29 = smov 0   ;;  %s1836_s30 = smov 0  }
   0x6 LB: > { %s1851_s9 = sadd.s32 4294967295, %s1760_s30   ;;  %s1365_s10 = sadd.s32 4294967294, %s1760_s30   ;;  %s1760_s30 = sphi %s1836_s30, %s2184_s30   ;;  %s1756_s29 = sphi %s1834_s29, %s2183_s29   ;;  %s1752_s28 = sphi %s1832_s28, %s2182_s28   ;;  %s1748_s27 = sphi %s1830_s27, %s2181_s27  }
   0x7   : > { %p45_p0 = scmp.ne.s32.totalorder %s1752_s28, %s1748_s27  ;;  %p2165_p1 = scmp.eq.s32.totalorder %s1851_s9, 0 }
   0x8   : > { %p227_p3 = scmp.eq.s32.totalorder %s1365_s10, 1  ;;  %p1366_p5 = scmp.ge.s32.totalorder %s1760_s30, 1 }
   0x9   : > { %p1860_p4 = por %p2165_p1, %p45_p0  ;;  %p234_p7 = scmp.lt.s32.totalorder %s1760_s30, 3 }
   0xa   : > { %p1865_p6 = por %p227_p3, %p45_p0  ;;  %s1762_s14 = smov [#allocation6]  }
   0xb   : > { %s2168_s11 = scalar_select %p1860_p4, 1, 0 }
   0xc   : > { %s2169_s12 = scalar_select %p1865_p6, 1, 0 }
   0xd   : > { %p1870_p8 = pnand %p1366_p5, %p234_p7  ;;  %s246_s15 = sshll.u32 %s1762_s14, 4  ;;  %s1874_s15 = int_to_ptr.vmem [resolvable:$true] %s246_s15 }
   0xe   : > { %s1763_s17 = smov [#allocation8]   ;;  %s1604_s21 = scalar_lea.hbm %s2158_s2, 512 }
   0xf   : > { %p1512_p9 = pneg %p1870_p8  ;;  %s262_s18 = sshll.u32 %s1763_s17, 4  ;;  %s1885_s18 = int_to_ptr.vmem [resolvable:$true] %s262_s18 }
  0x10   : > { %p1605_p12 = scmp.ne.s32.totalorder %s2158_s2, %s1604_s21  ;;  %p1611_p5 = scmp.lt.u32.totalorder %s1604_s21, %s2158_s2 }
  0x11   : > { %p1881_p11 = pnand %p1512_p9, %p2165_p1 }
  0x13   : > { %p1606_p13 = pneg %p1881_p11 }
  0x15   : > { %p1607_p0 = pnand %p1606_p13, %p1605_p12 }
  0x17   : > { %p1608_p3 = pneg %p1607_p0 }
  0x19   : > { %p1613_p7 = pnand %p1611_p5, %p1608_p3 }
  0x1b   : > { %1616 = shalt.err (!%p1613_p7)
}
  0x1c   : > { %s1617_s26 = scalar_lea.vmem %s1874_s15, 512  ;;  %p1625_p2 = scmp.lt.s32.totalorder %s1874_s15, %s1874_s15 }
  0x1d   : > { %p1618_p9 = scmp.ne.s32.totalorder %s1874_s15, %s1617_s26  ;;  %p1626_p12 = scmp.lt.s32.totalorder %s1617_s26, %s1617_s26 }
  0x1f   : > { %p1620_p10 = pnand %p1618_p9, %p1606_p13  ;;  %p1627_p0 = por %p1626_p12, %p1625_p2 }
  0x21   : > { %p1621_p1 = pneg %p1620_p10 }
  0x23   : > { %p1628_p6 = pnand %p1627_p0, %p1621_p1 }
  0x25   : > { %1631 = shalt.err (!%p1628_p6)
}
  0x26   : > { %s1764_s10 = smov 128   ;;  %s1765_s14 = smov 8  }
  0x27   : > { %1515 = dma.hbm_to_vmem [thread:$0]  (!%p1881_p11), %s2158_s2, 512, %s1874_s15, [#allocation7], %s1764_s10, %s1764_s10, %s1765_s14  }
  0x28   : > { %s1632_s22 = scalar_lea.hbm %s2160_s4, 512 }
  0x29   : > { %p1633_p2 = scmp.ne.s32.totalorder %s2160_s4, %s1632_s22  ;;  %p1639_p10 = scmp.lt.u32.totalorder %s1632_s22, %s2160_s4 }
  0x2b   : > { %p1635_p1 = pnand %p1633_p2, %p1606_p13 }
  0x2d   : > { %p1636_p6 = pneg %p1635_p1 }
  0x2f   : > { %p1641_p3 = pnand %p1639_p10, %p1636_p6 }
  0x31   : > { %1644 = shalt.err (!%p1641_p3)
}
  0x32   : > { %s1645_s15 = scalar_lea.vmem %s1885_s18, 512  ;;  %p1653_p12 = scmp.lt.s32.totalorder %s1885_s18, %s1885_s18 }
  0x33   : > { %p1646_p5 = scmp.ne.s32.totalorder %s1885_s18, %s1645_s15  ;;  %p1654_p0 = scmp.lt.s32.totalorder %s1645_s15, %s1645_s15 }
  0x35   : > { %p1648_p7 = pnand %p1646_p5, %p1606_p13  ;;  %p1655_p2 = por %p1654_p0, %p1653_p12 }
  0x37   : > { %p1649_p9 = pneg %p1648_p7 }
  0x39   : > { %p1656_p1 = pnand %p1655_p2, %p1649_p9 }
  0x3b   : > { %1659 = shalt.err (!%p1656_p1)
}
  0x3c   : > { %1518 = dma.hbm_to_vmem [thread:$0]  (!%p1881_p11), %s2160_s4, 512, %s1885_s18, [#allocation7], %s1764_s10, %s1764_s10, %s1765_s14  }
  0x3d   : > { %s1940_s20 = sadd.s32 1, %s1760_s30   ;;  %s32_s16 = sadd.s32 1, %s1756_s29 }
  0x3e   : > { %s29_s21 = ssub.s32 %s1760_s30, %s1940_s20  ;;  %p39_p13 = scmp.ne.s32.totalorder %s1756_s29, %s1752_s28 }
  0x3f   : > { %p30_p6 = scmp.eq.s32.totalorder %s29_s21, 0  ;;  %p40_p10 = scmp.eq.s32.totalorder %s1760_s30, 0 }
  0x40   : > { %p2172_p3 = scmp.eq.s32.totalorder %s1851_s9, 1  ;;  %p1529_p7 = scmp.lt.s32.totalorder %s1760_s30, 2 }
  0x41   : > { %s1956_s23 = scalar_select %p30_p6, %s1756_s29, %s32_s16  }
  0x42   : > { %p1950_p5 = por %p2172_p3, %p39_p13  ;;  %p41_p9 = por %p40_p10, %p39_p13 }
  0x43   : > { %s285_s24 = sand.u32 1, %s1756_s29   ;;  %s1371_s18 = sshll.u32 %s1760_s30, 7 }
  0x44   : > { %s2173_s22 = scalar_select %p1950_p5, 1, 0 }
  0x45   : > { %s1370_s25 = sshll.u32 %s285_s24, 3  ;;  %s1963_s26 = scalar_lea.hbm %s2156_s0, %s1371_s18 }
  0x46   : > { %s289_s15 = scalar_lea.vmem [#allocation3], %s1370_s25  ;;  %p1967_p11 = pnand %p1529_p7, %p41_p9 }
  0x47   : > { %s296_s17 = sshll.u32 %s289_s15, 4  ;;  %s286_s16 = scalar_lea.sflag [#allocation4], %s285_s24  ;;  %s1965_s17 = int_to_ptr.vmem [resolvable:$true] %s296_s17 }
  0x48   : > { %s1660_s21 = scalar_lea.hbm %s1963_s26, 128  ;;  %p1662_p0 = pneg %p1967_p11 }
  0x49   : > { %p1661_p12 = scmp.ne.s32.totalorder %s1963_s26, %s1660_s21  ;;  %s1665_s10 = scalar_lea.hbm %s2156_s0, 256 }
  0x4a   : > { %p1666_p13 = scmp.lt.u32.totalorder %s1963_s26, %s2156_s0  ;;  %p1667_p6 = scmp.lt.u32.totalorder %s1665_s10, %s1660_s21 }
  0x4b   : > { %p1663_p2 = pnand %p1662_p0, %p1661_p12  ;;  %p1669_p3 = scmp.lt.u32.totalorder %s1660_s21, %s1963_s26 }
  0x4c   : > { %p1668_p10 = por %p1667_p6, %p1666_p13 }
  0x4d   : > { %p1664_p1 = pneg %p1663_p2 }
  0x4e   : > { %p1670_p7 = por %p1669_p3, %p1668_p10 }
  0x50   : > { %p1671_p9 = pnand %p1670_p7, %p1664_p1 }
  0x52   : > { %1674 = shalt.err (!%p1671_p9)
}
  0x53   : > { %s1675_s24 = scalar_lea.vmem %s1965_s17, 128  ;;  %s1766_s18 = smov [#allocation3]  }
  0x54   : > { %p1676_p12 = scmp.ne.s32.totalorder %s1965_s17, %s1675_s24  ;;  %s1680_s25 = sshll.u32 %s1766_s18, 4  ;;  %s1681_s25 = int_to_ptr.vmem [resolvable:$false] %s1680_s25 }
  0x55   : > { %s1682_s14 = scalar_lea.vmem %s1681_s25, 256  ;;  %p1683_p4 = scmp.lt.s32.totalorder %s1965_s17, %s1681_s25 }
  0x56   : > { %p1678_p2 = pnand %p1676_p12, %p1662_p0  ;;  %p1684_p13 = scmp.lt.s32.totalorder %s1682_s14, %s1675_s24 }
  0x58   : > { %p1679_p5 = pneg %p1678_p2  ;;  %p1685_p6 = por %p1684_p13, %p1683_p4 }
  0x5a   : > { %p1686_p10 = pnand %p1685_p6, %p1679_p5 }
  0x5c   : > { %1689 = shalt.err (!%p1686_p10)
}
  0x5d   : > { %1522 = dma.hbm_to_vmem [thread:$0]  (!%p1967_p11), %s1963_s26, 128, %s1965_s17, %s286_s16  }
  0x5e   : > { %311 = sbr.rel (%p1870_p8) target bundleno = 2433 (0x981), region = 52  ;;  %s1999_s21 = sand.u32 (!%p1870_p8), 1, %s1752_s28  }
  0x5f   : > { %s1373_s10 = sshll.u32 (!%p1870_p8), %s1999_s21, 3  ;;  %s314_s15 = scalar_lea.sflag (!%p1870_p8), [#allocation4], %s1999_s21 }
  0x60   : > { %s317_s24 = scalar_lea.vmem (!%p1870_p8), [#allocation3], %s1373_s10  ;;  %p2175_p4 = scmp.ne.s32.totalorder (!%p1870_p8), %s2168_s11, 0 }
  0x65   : > { %1735 = dma.done.wait (%p2175_p4), %s314_s15, 128  }
  0x66   : > { %1737 = vsyncadd (%p2175_p4), %s314_s15, 4294967168  ;;  %p2176_p5 = scmp.eq.s32.totalorder %s1851_s9, 0 }
  0x68   : > { %1739 = dma.done.wait (%p2176_p5), [#allocation7], 1024   ;;  %p2177_p8 = pmov %p2176_p5 }
  0x69   : > { %v1767_v0 = vmov 0.0|0.0   ;;  %vm1768_vm0 = vmmov 0   ;;  %v1769_v1 = vmov 0.0   ;;  %v365_v2 = vld [vmem:[#allocation6] sm:$0xff]  ;;  %v366_v3 = vld [vmem:[#allocation6 + $0x8] sm:$0xff]  ;;  %v367_v4 = vld [vmem:[#allocation6 + $0x10] sm:$0xff] }
  0x6a   : > { %1741 = vsyncadd (%p2177_p8), [#allocation7], 4294966272  ;;  %1488 = vmatprep.subr.bf16.mxu0 %v1767_v0  ;;  %1434 = vmatprep.mubr.msk.f32.mxu0 %vm1768_vm0, %v1769_v1  ;;  %v1489_v5 = vpack.c.bf16 %v366_v3, %v365_v2  ;;  %v368_v6 = vld [vmem:[#allocation6 + $0x18] sm:$0xff]  ;;  %vm376_vm1 = vcmask 261120   ;;  %v1377_v9 = vld [vmem:[%s2159_s3] ss:$0 sm:$0xff] }
  0x6b   : > { %1437 = vmatprep.subr.mxu1 %v1769_v1  ;;  %1439 = vmatprep.mubr.msk.f32.mxu1 %vm1768_vm0, %v1769_v1  ;;  %v1492_v7 = vpack.c.bf16 %v368_v6, %v367_v4  ;;  %v2020_v8 = vld [vmem:[%s317_s24] sm:$0xff]  ;;  %s1770_s26 = smov 64   ;;  %s1771_s17 = smov 96   ;;  %vm460_vm2 = vcmask 64512   ;;  %vm792_vm3 = vcmask 130112   ;;  %vm963_vm4 = vcmask 195712  }
  0x6c   : > { %1490 = vmatpush3.bf16.msra.mxu0 %v1489_v5  ;;  %s1772_s19 = smov 88   ;;  %s1773_s16 = smov 120   ;;  %vm1134_vm5 = vcmask 261312  }
  0x6d   : > { %1491 = vmatprep.subr.bf16.mxu0 %v1767_v0  ;;  %s1774_s18 = smov 80   ;;  %p361_p11 = scmp.lt.s32.totalorder %s1851_s9, 1 }
  0x6e   : > { %s1775_s11 = smov 72   ;;  %s1776_s13 = smov 112  }
  0x6f   : > { %s362_s25 = scalar_select %p361_p11, %s1851_s9, 1 }
  0x70   : > { %1493 = vmatpush3.bf16.msra.mxu0 %v1492_v7  ;;  %s1783_s14 = smov 24   ;;  %p2178_p1 = scmp.ne.s32.totalorder %s2173_s22, 0 }
  0x71   : > { %1457 = vmatprep.subr.mxu0 %v1769_v1  ;;  %s363_s24 = scalar_lea.vmem %s2157_s1, %s362_s25  ;;  %s1782_s25 = smov 16  }
  0x72   : > { %v1379_v18 = vld [vmem:[%s363_s24] ss:$0 sm:$0xff]  ;;  %s1254_s24 = scalar_lea.sflag [#allocation5], %s1999_s21 }
  0x73   : > { %1435 = vmatmul.mubr.msk.f32.vlgmr.msra.gmra.mrb[0].mxu0 %vm376_vm1, %v2020_v8 }
  0x74   : > { %1459 = vmatprep.mubr.msk.f32.mxu0 %vm1768_vm0, %v1769_v1 }
 0x146   : > { %v446_v10 = vpop.f32.mrb[0].mxu0 }
 0x147   : > { %v2030_v11 = vadd.f32 %v1377_v9, %v446_v10  ;;  %v1436_v12 = vpop.f32.mrb[1].mxu0 }
 0x149   : > { %546 = vrot.lane.b32.xlu1 %v2030_v11, %s1770_s26  ;;  %458 = vrot.lane.b32.xlu0 %v2030_v11, %s1771_s17  ;;  %s1777_s26 = smov 104   ;;  %s1778_s17 = smov 56  }
 0x14d   : > { %625 = vrot.lane.b32.xlu1 %v2030_v11, %s1772_s19  ;;  %s1779_s19 = smov 48  }
 0x151   : > { %623 = vrot.lane.b32.xlu1 %v2030_v11, %s1773_s16  ;;  %s1780_s16 = smov 40  }
 0x155   : > { %796 = vrot.lane.b32.xlu1 %v2030_v11, %s1774_s18  ;;  %s1781_s18 = smov 8  }
 0x1bb   : > { %v547_v13 = vpop.permute.xlu1 %546  ;;  %v459_v14 = vpop.permute.xlu0 %458 }
 0x1bc   : > { %1438 = vmatpush3.xpose.msk.msra.mxu1 %vm460_vm2, %v459_v14  ;;  %v1137_v14 = vld [vmem:[#allocation8] sm:$0xff] }
 0x1bd   : > { %1442 = vmatprep.subr.mxu1 %v1769_v1 }
 0x1bf   : > { %v626_v15 = vpop.permute.xlu1 %625  ;;  %1440 = vmatmul.mubr.msk.f32.vlgmr.msra.gmra.mrb[0].mxu1 %vm460_vm2, %v2030_v11 }
 0x1c0   : > { %1443 = vmatpush3.msra.mxu1 %v547_v13  ;;  %1444 = vmatprep.mubr.msk.f32.mxu1 %vm1768_vm0, %v1769_v1 }
 0x1c1   : > { %1447 = vmatprep.subr.mxu1 %v1769_v1 }
 0x1c3   : > { %v624_v16 = vpop.permute.xlu1 %623 }
 0x1c7   : > { %v797_v17 = vpop.permute.xlu1 %796 }
 0x1c8   : > { %1458 = vmatpush3.xpose.msk.msra.mxu0 %vm460_vm2, %v797_v17  ;;  %v1139_v17 = vld [vmem:[#allocation8 + $0x10] sm:$0xff] }
 0x1c9   : > { %1467 = vmatprep.subr.mxu0 %v1769_v1 }
 0x292   : > { %v531_v19 = vpop.f32.mrb[0].mxu1 }
 0x293   : > { %v532_v20 = vadd.f32 %v1379_v18, %v531_v19  ;;  %v1441_v21 = vpop.f32.mrb[1].mxu1 }
 0x295   : > { %v535_v22 = vsel %vm460_vm2, %v532_v20, -inf }
 0x296   : > { %536 = vmax.xlane.f32.xlu0 %v535_v22 }
 0x2ac   : > { %967 = vrot.lane.b32.xlu0 %v2030_v11, %s1775_s11 }
 0x323   : > { %v537_v23 = vpop.xlane.xlu0 %536 }
 0x324   : > { %v538_v24 = vsub.f32 %v532_v20, %v537_v23 }
 0x326   : > { %v539_v25 = vmul.f32 1.442695, %v538_v24 }
 0x327   : > { %v968_v30 = vpop.permute.xlu0 %967 }
 0x328   : > { %1586 = vpow2.f32 %v539_v25 }
 0x332   : > { %v1587_v26 = vpop.eup %1586 }
 0x333   : > { %v541_v27 = vsel %vm460_vm2, %v1587_v26, 0.0 }
 0x334   : > { %542 = vadd.xlane.f32.xlu1 %v541_v27 }
 0x345   : > { %794 = vrot.lane.b32.xlu1 %v2030_v11, %s1776_s13 }
 0x349   : > { %965 = vrot.lane.b32.xlu1 %v2030_v11, %s1777_s26 }
 0x3c1   : > { %v543_v28 = vpop.xlane.xlu1 %542 }
 0x3c2   : > { %1588 = vrcp.f32 %v543_v28  ;;  %v1392_v28 = vld [vmem:[%s2161_s5] ss:$0 sm:$0xff] }
 0x3c5   : > { %v795_v29 = vpop.permute.xlu1 %794 }
 0x3c6   : > { %1460 = vmatmul.mubr.msk.f32.vlgmr.msra.gmra.mrb[2].mxu0 %vm460_vm2, %v795_v29 }
 0x3c7   : > { %1468 = vmatpush3.xpose.msk.msra.mxu0 %vm460_vm2, %v968_v30  ;;  %1469 = vmatprep.mubr.msk.f32.mxu0 %vm1768_vm0, %v1769_v1 }
 0x3c8   : > { %1494 = vmatprep.subr.bf16.mxu0 %v1767_v0 }
 0x3c9   : > { %v966_v31 = vpop.permute.xlu1 %965 }
 0x3ca   : > { %1470 = vmatmul.mubr.msk.f32.vlgmr.msra.gmra.mrb[4].mxu0 %vm460_vm2, %v966_v31 }
 0x3cb   : > { %1485 = vmatprep.mubr.msk.f32.mxu0 %vm1768_vm0, %v1769_v1 }
 0x3cc   : > { %v1589_v32 = vpop.eup %1588 }
 0x3cd   : > { %v545_v33 = vmul.f32 %v1589_v32, %v1587_v26 }
 0x3cf   : > { %1445 = vmatmul.mubr.msk.f32.vlgmr.msra.gmra.mrb[2].mxu1 %vm460_vm2, %v545_v33 }
 0x3d0   : > { %1448 = vmatpush3.xpose.msk.msra.mxu1 %vm460_vm2, %v626_v15  ;;  %1449 = vmatprep.mubr.msk.f32.mxu1 %vm1768_vm0, %v1769_v1  ;;  %v1138_v15 = vld [vmem:[#allocation8 + $0x8] sm:$0xff] }
 0x3d1   : > { %1452 = vmatprep.subr.mxu1 %v1769_v1 }
 0x3d3   : > { %1450 = vmatmul.mubr.msk.f32.vlgmr.msra.gmra.mrb[4].mxu1 %vm460_vm2, %v624_v16  ;;  %v1495_v16 = vpack.c.bf16 %v1138_v15, %v1137_v14 }
 0x3d4   : > { %1454 = vmatprep.mubr.msk.f32.mxu1 %vm1768_vm0, %v1769_v1 }
 0x3d5   : > { %1496 = vmatpush3.bf16.msra.mxu0 %v1495_v16 }
 0x3d6   : > { %1497 = vmatprep.subr.bf16.mxu0 %v1767_v0 }
 0x499   : > { %v868_v34 = vpop.f32.mrb[2].mxu0 }
 0x49a   : > { %v869_v35 = vadd.f32 %v1379_v18, %v868_v34  ;;  %v1461_v36 = vpop.f32.mrb[3].mxu0 }
 0x49c   : > { %v872_v37 = vsel %vm460_vm2, %v869_v35, -inf }
 0x49d   : > { %873 = vmax.xlane.f32.xlu0 %v872_v37  ;;  %v1039_v38 = vpop.f32.mrb[4].mxu0 }
 0x49e   : > { %v1471_v39 = vpop.f32.mrb[5].mxu0  ;;  %v1040_v45 = vadd.f32 %v1379_v18, %v1039_v38 }
 0x4a0   : > { %v1043_v47 = vsel %vm460_vm2, %v1040_v45, -inf }
 0x4a2   : > { %v618_v40 = vpop.f32.mrb[2].mxu1 }
 0x4a3   : > { %622 = vst.msk [vmem:[#allocation2] sm:$0xff] %vm460_vm2, %v618_v40  ;;  %v1446_v41 = vpop.f32.mrb[3].mxu1 }
 0x4a6   : > { %v697_v42 = vpop.f32.mrb[4].mxu1 }
 0x4a7   : > { %v698_v43 = vadd.f32 %v1379_v18, %v697_v42  ;;  %v1451_v44 = vpop.f32.mrb[5].mxu1  ;;  %v1140_v18 = vld [vmem:[#allocation8 + $0x18] sm:$0xff] }
 0x4a8   : > { %v1498_v19 = vpack.c.bf16 %v1140_v18, %v1139_v17  ;;  %v1395_v44 = vld [vmem:[%s2163_s7] ss:$0 sm:$0xff] }
 0x4a9   : > { %v701_v46 = vsel %vm460_vm2, %v698_v43, -inf }
 0x4aa   : > { %702 = vmax.xlane.f32.xlu1 %v701_v46  ;;  %1499 = vmatpush3.bf16.msra.mxu0 %v1498_v19 }
 0x4ae   : > { %1044 = vmax.xlane.f32.xlu1 %v1043_v47 }
 0x52a   : > { %v874_v48 = vpop.xlane.xlu0 %873 }
 0x52b   : > { %v875_v49 = vsub.f32 %v869_v35, %v874_v48 }
 0x52d   : > { %v876_v50 = vmul.f32 1.442695, %v875_v49 }
 0x52f   : > { %1590 = vpow2.f32 %v876_v50 }
 0x537   : > { %v703_v51 = vpop.xlane.xlu1 %702 }
 0x538   : > { %v704_v59 = vsub.f32 %v698_v43, %v703_v51 }
 0x539   : > { %v1591_v52 = vpop.eup %1590 }
 0x53a   : > { %v878_v53 = vsel %vm460_vm2, %v1591_v52, 0.0  ;;  %v705_v60 = vmul.f32 1.442695, %v704_v59 }
 0x53b   : > { %879 = vadd.xlane.f32.xlu1 %v878_v53  ;;  %v1045_v54 = vpop.xlane.xlu1 %1044 }
 0x53c   : > { %v1046_v55 = vsub.f32 %v1040_v45, %v1045_v54 }
 0x53e   : > { %v1047_v56 = vmul.f32 1.442695, %v1046_v55 }
 0x540   : > { %1592 = vpow2.f32 %v1047_v56 }
 0x541   : > { %1594 = vpow2.f32 %v705_v60 }
 0x54a   : > { %v1593_v57 = vpop.eup %1592 }
 0x54b   : > { %v1049_v58 = vsel %vm460_vm2, %v1593_v57, 0.0  ;;  %v1595_v61 = vpop.eup %1594 }
 0x54c   : > { %712 = vrot.lane.b32.xlu1 %v2030_v11, %s1778_s17  ;;  %1050 = vadd.xlane.f32.xlu0 %v1049_v58  ;;  %v707_v62 = vsel %vm460_vm2, %v1595_v61, 0.0 }
 0x562   : > { %883 = vrot.lane.b32.xlu0 %v2030_v11, %s1779_s19  ;;  %s1397_s19 = sshll.u32 %s1851_s9, 7  ;;  %s1784_s9 = smov [#allocation9]  }
 0x563   : > { %s2111_s15 = scalar_lea.hbm %s2164_s8, %s1397_s19 }
 0x570   : > { %708 = vadd.xlane.f32.xlu1 %v707_v62 }
 0x581   : > { %1054 = vrot.lane.b32.xlu1 %v2030_v11, %s1780_s16  ;;  %s360_s16 = scalar_lea.vmem [#allocation9], %s1373_s10  ;;  %s1694_s10 = sshll.u32 %s1784_s9, 4  ;;  %s1695_s10 = int_to_ptr.vmem [resolvable:$false] %s1694_s10 }
 0x582   : > { %s1696_s13 = scalar_lea.vmem %s1695_s10, 256 }
 0x5c8   : > { %v880_v63 = vpop.xlane.xlu1 %879 }
 0x5cc   : > { %v713_v2 = vpop.permute.xlu1 %712 }
 0x5cd   : > { %1453 = vmatpush3.msra.mxu1 %v713_v2 }
 0x5ce   : > { %1462 = vmatprep.subr.mxu1 %v1769_v1 }
 0x5d9   : > { %v1051_v4 = vpop.xlane.xlu0 %1050 }
 0x5dd   : > { %v884_v9 = vpop.permute.xlu0 %883 }
 0x5fd   : > { %v709_v3 = vpop.xlane.xlu1 %708 }
 0x5fe   : > { %1596 = vrcp.f32 %v709_v3 }
 0x5ff   : > { %1598 = vrcp.f32 %v880_v63 }
 0x600   : > { %1600 = vrcp.f32 %v1051_v4 }
 0x601   : > { %v1055_v12 = vpop.permute.xlu1 %1054 }
 0x608   : > { %v1597_v5 = vpop.eup %1596 }
 0x609   : > { %v711_v6 = vmul.f32 %v1597_v5, %v1595_v61  ;;  %v1599_v7 = vpop.eup %1598 }
 0x60a   : > { %v882_v10 = vmul.f32 %v1599_v7, %v1591_v52  ;;  %v1601_v11 = vpop.eup %1600 }
 0x60b   : > { %1455 = vmatmul.mubr.msk.f32.vlgmr.msra.gmra.mrb[6].mxu1 %vm460_vm2, %v711_v6  ;;  %v1053_v13 = vmul.f32 %v1601_v11, %v1593_v57 }
 0x60c   : > { %1463 = vmatpush3.msra.mxu1 %v884_v9  ;;  %1464 = vmatprep.mubr.msk.f32.mxu1 %vm1768_vm0, %v1769_v1 }
 0x60d   : > { %1472 = vmatprep.subr.mxu1 %v1769_v1 }
 0x60f   : > { %1465 = vmatmul.mubr.msk.f32.vlgmr.msra.gmra.mrb[8].mxu1 %vm460_vm2, %v882_v10 }
 0x610   : > { %1473 = vmatpush3.msra.mxu1 %v1055_v12  ;;  %1474 = vmatprep.mubr.msk.f32.mxu1 %vm1768_vm0, %v1769_v1 }
 0x613   : > { %1475 = vmatmul.mubr.msk.f32.vlgmr.msra.gmra.mrb[10].mxu1 %vm460_vm2, %v1053_v13 }
 0x6de   : > { %v784_v20 = vpop.f32.mrb[6].mxu1 }
 0x6df   : > { %789 = vrot.lane.b32.xlu1 %v784_v20, %s1781_s18  ;;  %v1456_v21 = vpop.f32.mrb[7].mxu1  ;;  %s1267_s18 = sshll.u32 %s360_s16, 4  ;;  %s2113_s18 = int_to_ptr.vmem [resolvable:$true] %s1267_s18 }
 0x6e0   : > { %s1690_s11 = scalar_lea.vmem %s2113_s18, 128  ;;  %p1697_p9 = scmp.lt.s32.totalorder %s2113_s18, %s1695_s10 }
 0x6e1   : > { %p1691_p0 = scmp.ne.s32.totalorder %s2113_s18, %s1690_s11  ;;  %p1698_p12 = scmp.lt.s32.totalorder %s1696_s13, %s1690_s11 }
 0x6e2   : > { %v955_v22 = vpop.f32.mrb[8].mxu1 }
 0x6e3   : > { %960 = vrot.lane.b32.xlu0 %v955_v22, %s1782_s25  ;;  %v1466_v1 = vpop.f32.mrb[9].mxu1  ;;  %p1692_p3 = pnand %p1691_p0, %p2178_p1  ;;  %p1699_p2 = por %p1698_p12, %p1697_p9 }
 0x6e5   : > { %p1693_p7 = pneg %p1692_p3 }
 0x6e6   : > { %v1126_v23 = vpop.f32.mrb[10].mxu1 }
 0x6e7   : > { %1131 = vrot.lane.b32.xlu1 %v1126_v23, %s1783_s14  ;;  %v1476_v24 = vpop.f32.mrb[11].mxu1  ;;  %p1700_p13 = pnand %p1699_p2, %p1693_p7 }
 0x751   : > { %v790_v25 = vpop.permute.xlu1 %789 }
 0x752   : > { %793 = vst.msk [vmem:[#allocation2] sm:$0xff] %vm792_vm3, %v790_v25 }
 0x755   : > { %v961_v26 = vpop.permute.xlu0 %960 }
 0x756   : > { %964 = vst.msk [vmem:[#allocation2] sm:$0xff] %vm963_vm4, %v961_v26 }
 0x759   : > { %v1132_v0 = vpop.permute.xlu1 %1131 }
 0x75a   : > { %1135 = vst.msk [vmem:[#allocation2] sm:$0xff] %vm1134_vm5, %v1132_v0 }
 0x761   : > { %v1136_v27 = vld [vmem:[#allocation2] sm:$0xff] }
 0x762   : > { %1486 = vmatmul.mubr.msk.f32.vlgmr.msra.gmra.mrb[6].mxu0 %vm376_vm1, %v1136_v27 }
 0x835   : > { %v1217_v29 = vpop.f32.mrb[6].mxu0 }
 0x836   : > { %v1218_v30 = vadd.f32 %v1392_v28, %v1217_v29  ;;  %v1487_v31 = vpop.f32.mrb[7].mxu0 }
 0x838   : > { %v1221_v32 = vadd.f32 %v1218_v30, %v2020_v8  ;;  %v1394_v8 = vld [vmem:[%s2162_s6] ss:$0 sm:$0xff] }
 0x83a   : > { %v1222_v33 = vsel %vm376_vm1, %v1221_v32, 0.0 }
 0x83b   : > { %1223 = vadd.xlane.f32.xlu0 %v1222_v33 }
 0x8c8   : > { %v1224_v34 = vpop.xlane.xlu0 %1223 }
 0x8c9   : > { %v1226_v35 = vmul.f32 0.03125, %v1224_v34 }
 0x8cb   : > { %v1227_v36 = vsub.f32 %v1221_v32, %v1226_v35 }
 0x8cd   : > { %v1228_v37 = vmul.f32 %v1227_v36, %v1227_v36 }
 0x8cf   : > { %v1229_v38 = vsel %vm376_vm1, %v1228_v37, 0.0 }
 0x8d0   : > { %1230 = vadd.xlane.f32.xlu1 %v1229_v38 }
 0x95d   : > { %v1231_v39 = vpop.xlane.xlu1 %1230 }
 0x95e   : > { %v1232_v40 = vmul.f32 0.03125, %v1231_v39 }
 0x960   : > { %v1233_v41 = vadd.f32 1e-12, %v1232_v40 }
 0x962   : > { %1602 = vrsqrt.f32 %v1233_v41 }
 0x96c   : > { %v1603_v42 = vpop.eup %1602 }
 0x96d   : > { %v1235_v43 = vmul.f32 %v1603_v42, %v1227_v36 }
 0x96f   : > { %v1243_v45 = vmul.f32 %v1394_v8, %v1235_v43 }
 0x971   : > { %v1251_v46 = vadd.f32 %v1395_v44, %v1243_v45 }
 0x973   : > { %1252 = vst.msk [vmem:[%s360_s16] sm:$0xff] %vm376_vm1, %v1251_v46 }
 0x974   : > { %1703 = shalt.err (!%p1700_p13)
}
 0x975   : > { %s1704_s21 = scalar_lea.hbm %s2111_s15, 128  ;;  %s1708_s19 = scalar_lea.hbm %s2164_s8, 256 }
 0x976   : > { %p1705_p6 = scmp.ne.s32.totalorder %s2111_s15, %s1704_s21  ;;  %p1709_p5 = scmp.lt.u32.totalorder %s2111_s15, %s2164_s8 }
 0x977   : > { %p1710_p8 = scmp.lt.u32.totalorder %s1708_s19, %s1704_s21  ;;  %p1712_p0 = scmp.lt.u32.totalorder %s1704_s21, %s2111_s15 }
 0x978   : > { %p1706_p10 = pnand %p1705_p6, %p2178_p1 }
 0x979   : > { %p1711_p11 = por %p1710_p8, %p1709_p5 }
 0x97a   : > { %p1707_p4 = pneg %p1706_p10 }
 0x97b   : > { %p1713_p3 = por %p1712_p0, %p1711_p11 }
 0x97d   : > { %p1714_p7 = pnand %p1713_p3, %p1707_p4 }
 0x97f   : > { %1717 = shalt.err (!%p1714_p7)
}
 0x980   : > { %1510 = dma.vmem_to_hbm [thread:$0]  (%p2178_p1), %s2113_s18, 128, %s2111_s15, %s1254_s24  }
 0x981 PF: > { %s1279_s14 = sand.u32 1, %s1748_s27   ;;  %p2179_p9 = scmp.ne.s32.totalorder %s2169_s12, 0 }
 0x982   : > { %p2180_p12 = scmp.ge.s32.totalorder %s1760_s30, 2  ;;  %s1280_s11 = scalar_lea.sflag [#allocation5], %s1279_s14 }
 0x984   : > { %p1524_p2 = pnand %p2180_p12, %p2179_p9 }
 0x986   : > { %1743 = dma.done.wait (!%p1524_p2), %s1280_s11, 128  }
 0x987   : > { %1745 = vsyncadd (!%p1524_p2), %s1280_s11, 4294967168  ;;  %p22_p13 = scmp.ge.s32.totalorder %s1940_s20, 4   ;;  %s2181_s27 = smov %s1752_s28 }
 0x988   : > { %s2182_s28 = smov %s1756_s29  ;;  %s2183_s29 = smov %s1956_s23 }
 0x989   : > { %s2184_s30 = smov %s1940_s20  ;;  %24 = sbr.rel (!%p22_p13) target bundleno = 6 (0x6), region = 108 }
 0x990   :  { %1285 = vsyncpa [#allocation4], 1 }
 0x991   :  { %1287 = vsyncpa [#allocation4 + $0x1], 1 }
 0x992   :  { %1288 = vsyncpa [#allocation7], 1 }
 0x993   :  { %1289 = vsyncpa [#allocation5], 1 }
 0x994   :  { %1291 = vsyncpa [#allocation5 + $0x1], 1 }

</bundles_post_ra>
